<compile_context>
chip_gen: v7x
topology: tpu7x:2x2x1
jax: 0.10.0
libtpu: 0.0.40
codegen_flags: <defaults>
</compile_context>

<pallas_src>
import math

import jax
import jax.numpy as jnp
from jax.experimental import pallas as pl
from jax.experimental.pallas import tpu as pltpu


def _round_up(n, m):
    return ((n + m - 1) // m) * m


def _mlp_kernel(x_ref, w1_ref, b1_ref, w2_ref, b2_ref, w3_ref, b3_ref, o_ref):
    # x_ref: (TB, in_len) f32   w1: (in_len,128) bf16   w2: (128,256) bf16
    # b1: (1,128) f32  b2: (1,256) f32  w3: (1,256) f32  b3: (1,1) f32 in SMEM
    x = x_ref[...].astype(jnp.bfloat16)        # in-kernel cast: no extra HBM pass

    h1 = jnp.dot(x, w1_ref[...], preferred_element_type=jnp.float32) + b1_ref[...]
    h1 = jnp.maximum(h1, 0.0)                  # ReLU (VPU)

    h2 = jnp.dot(h1.astype(jnp.bfloat16), w2_ref[...],
                 preferred_element_type=jnp.float32) + b2_ref[...]
    h2 = jnp.maximum(h2, 0.0)                  # ReLU (VPU)

    # 256 -> 1 layer: VPU multiply + XLU lane reduction instead of an N=1 matmul.
    h3 = jnp.sum(h2 * w3_ref[...], axis=-1, keepdims=True) + b3_ref[0, 0]
    o_ref[...] = jnp.tanh(h3).astype(o_ref.dtype)   # Tanh (EUP)


def _choose_tiling(batch, block_batch):
    """Pick (batch_tile, padded_batch).

    Rows aligned to 16 (bf16 sublane packing); large tiles aligned to 256 (MXU
    M granularity).  If the whole batch fits in one tile but is big, split it
    into two tiles so the "parallel" grid axis can shard over v7x's 2 TCs.
    """
    block_batch = max(256, _round_up(block_batch, 256))
    batch_a = _round_up(batch, 16)
    if batch_a <= block_batch:
        if batch_a >= 1024:
            tb = _round_up((batch_a + 1) // 2, 256)   # >=2 grid steps for v7x
        else:
            tb = batch_a                              # tiny batch: single tile
    else:
        tb = block_batch
    return tb, _round_up(batch_a, tb)


def position_decoder_forward(x, params, *, block_batch=4096):
    """x: (batch, in_len) float32  ->  (batch, 1) float32."""
    w1, b1, w2, b2, w3, b3 = params
    batch, in_len = x.shape
    h1_dim, h2_dim = w1.shape[1], w2.shape[1]

    tb, batch_p = _choose_tiling(batch, block_batch)
    if batch_p != batch:
        x = jnp.pad(x, ((0, batch_p - batch), (0, 0)))

    # Only the small weights are pre-cast to bf16 for the MXU; x stays f32 and
    # is cast inside the kernel.  Biases / w3 / tanh stay f32.
    w1_bf = w1.astype(jnp.bfloat16)
    w2_bf = w2.astype(jnp.bfloat16)
    b1_f = b1.reshape(1, h1_dim).astype(jnp.float32)
    b2_f = b2.reshape(1, h2_dim).astype(jnp.float32)
    w3_row = w3.reshape(1, h2_dim).astype(jnp.float32)   # (1, 256) row for VPU
    b3_s = b3.reshape(1, 1).astype(jnp.float32)          # single SMEM scalar

    grid = (batch_p // tb,)

    flops = 2 * batch_p * (in_len * h1_dim + h1_dim * h2_dim + h2_dim)
    bytes_accessed = (x.nbytes + w1_bf.nbytes + w2_bf.nbytes + b1_f.nbytes
                      + b2_f.nbytes + w3_row.nbytes + b3_s.nbytes + batch_p * 4)

    out = pl.pallas_call(
        _mlp_kernel,
        out_shape=jax.ShapeDtypeStruct((batch_p, 1), jnp.float32),
        grid=grid,
        in_specs=[
            pl.BlockSpec((tb, in_len), lambda i: (i, 0)),          # x: batch-tiled, pipelined
            pl.BlockSpec(w1_bf.shape, lambda i: (0, 0)),           # weights resident in VMEM
            pl.BlockSpec(b1_f.shape, lambda i: (0, 0)),
            pl.BlockSpec(w2_bf.shape, lambda i: (0, 0)),
            pl.BlockSpec(b2_f.shape, lambda i: (0, 0)),
            pl.BlockSpec(w3_row.shape, lambda i: (0, 0)),
            pl.BlockSpec(memory_space=pltpu.MemorySpace.SMEM),     # b3 scalar in SMEM
        ],
        out_specs=pl.BlockSpec((tb, 1), lambda i: (i, 0)),
        compiler_params=pltpu.CompilerParams(
            dimension_semantics=("parallel",),
            vmem_limit_bytes=32 << 20,
        ),
        cost_estimate=pl.CostEstimate(
            flops=flops, transcendentals=batch_p, bytes_accessed=bytes_accessed),
    )(x, w1_bf, b1_f, w2_bf, b2_f, w3_row, b3_s)

    return out[:batch]


def init_params(in_len, key):
    """Deterministic PyTorch-style (Kaiming-uniform) init for the 3 Linear layers."""
    def linear(key, fan_in, fan_out):
        kw, kb = jax.random.split(key)
        bound = 1.0 / math.sqrt(fan_in)
        # Stored as (in_features, out_features) so the kernel computes x @ W.
        w = jax.random.uniform(kw, (fan_in, fan_out), jnp.float32, -bound, bound)
        b = jax.random.uniform(kb, (1, fan_out), jnp.float32, -bound, bound)
        return w, b

    k1, k2, k3 = jax.random.split(key, 3)
    w1, b1 = linear(k1, in_len, 128)
    w2, b2 = linear(k2, 128, 256)
    w3, b3 = linear(k3, 256, 1)
    return w1, b1, w2, b2, w3, b3


def reference_forward(x, params):
    """Mirrors the kernel's math (bf16 MXU operands, f32 accumulation)."""
    w1, b1, w2, b2, w3, b3 = params
    h1 = jnp.dot(x.astype(jnp.bfloat16), w1.astype(jnp.bfloat16),
                 preferred_element_type=jnp.float32) + b1
    h1 = jnp.maximum(h1, 0.0)
    h2 = jnp.dot(h1.astype(jnp.bfloat16), w2.astype(jnp.bfloat16),
                 preferred_element_type=jnp.float32) + b2
    h2 = jnp.maximum(h2, 0.0)
    h3 = jnp.sum(h2 * w3.reshape(1, -1), axis=-1, keepdims=True) + b3.reshape(1, 1)
    return jnp.tanh(h3)


def _check(x, params, **kw):
    out = jax.block_until_ready(position_decoder_forward(x, params, **kw))
    ref = reference_forward(x, params)
    assert out.shape == (x.shape[0], 1), out.shape
    err = float(jnp.max(jnp.abs(out - ref)))
    assert jnp.allclose(out, ref, atol=2e-3, rtol=2e-3), err
    return out


if __name__ == "__main__":
    in_len = 32
    key = jax.random.PRNGKey(0)
    kx, kp = jax.random.split(key)
    params = init_params(in_len, kp)

    # Case 1: small aligned batch (single tile).
    x1 = jax.random.normal(kx, (8, in_len), jnp.float32)
    _check(x1, params)

    # Case 2: batch not a multiple of 16 (exercises the padding path).
    x2 = jax.random.normal(jax.random.PRNGKey(1), (10, in_len), jnp.float32)
    _check(x2, params)

    # Case 3: larger batch -> split into 2 tiles (v7x two-TensorCore path).
    x3 = jax.random.normal(jax.random.PRNGKey(2), (2500, in_len), jnp.float32)
    _check(x3, params)

    # Case 4: multi-step grid path (batch > block_batch).
    _check(x3, params, block_batch=512)

    print("KERNEL_OK")
</pallas_src>

<mosaic_0001>
module attributes {stable_mosaic.version = 11 : i64} {
  func.func @_mlp_kernel(%arg0: i32, %arg1: memref<16x32xf32, #tpu.memory_space<vmem>>, %arg2: memref<32x128xbf16, #tpu.memory_space<vmem>>, %arg3: memref<1x128xf32, #tpu.memory_space<vmem>>, %arg4: memref<128x256xbf16, #tpu.memory_space<vmem>>, %arg5: memref<1x256xf32, #tpu.memory_space<vmem>>, %arg6: memref<1x256xf32, #tpu.memory_space<vmem>>, %arg7: memref<1x1xf32, #tpu.memory_space<smem>>, %arg8: memref<16x1xf32, #tpu.memory_space<vmem>>) attributes {dimension_semantics = [#tpu.dimension_semantics<parallel>], iteration_bounds = array<i64: 1>, scalar_prefetch = 0 : i64, scratch_operands = 0 : i64, tpu.core_type = #tpu.core_type<tc>, window_params = [{transform_indices = @transform_0, window_bounds = array<i64: 16, 32>}, {pipeline_mode = #tpu.pipeline_mode<synchronous>, transform_indices = @transform_1, window_bounds = array<i64: 32, 128>}, {pipeline_mode = #tpu.pipeline_mode<synchronous>, transform_indices = @transform_2, window_bounds = array<i64: 1, 128>}, {pipeline_mode = #tpu.pipeline_mode<synchronous>, transform_indices = @transform_3, window_bounds = array<i64: 128, 256>}, {pipeline_mode = #tpu.pipeline_mode<synchronous>, transform_indices = @transform_4, window_bounds = array<i64: 1, 256>}, {pipeline_mode = #tpu.pipeline_mode<synchronous>, transform_indices = @transform_5, window_bounds = array<i64: 1, 256>}, {transform_indices = @transform_6, window_bounds = array<i64: 1, 1>}, {transform_indices = @transform_7, window_bounds = array<i64: 16, 1>}]} {
    %c0 = arith.constant 0 : index
    %c0_0 = arith.constant 0 : index
    %0 = vector.load %arg1[%c0, %c0_0] : memref<16x32xf32, #tpu.memory_space<vmem>>, vector<16x32xf32>
    %1 = arith.truncf %0 : vector<16x32xf32> to vector<16x32xbf16>
    %c0_1 = arith.constant 0 : index
    %c0_2 = arith.constant 0 : index
    %2 = vector.load %arg2[%c0_1, %c0_2] : memref<32x128xbf16, #tpu.memory_space<vmem>>, vector<32x128xbf16>
    %cst = arith.constant dense<0.000000e+00> : vector<16x128xf32>
    %3 = tpu.matmul %1, %2, %cst {dimension_numbers = #tpu.dot_dimension_numbers<[1], [0], [0], [1], [0, 0, 1, 1], [], []>} : vector<16x32xbf16>, vector<32x128xbf16>, vector<16x128xf32> -> vector<16x128xf32>
    %c0_3 = arith.constant 0 : index
    %c0_4 = arith.constant 0 : index
    %4 = vector.load %arg3[%c0_3, %c0_4] : memref<1x128xf32, #tpu.memory_space<vmem>>, vector<1x128xf32>
    %5 = vector.broadcast %4 : vector<1x128xf32> to vector<16x128xf32>
    %6 = arith.addf %3, %5 : vector<16x128xf32>
    %cst_5 = arith.constant 0.000000e+00 : f32
    %7 = vector.broadcast %cst_5 : f32 to vector<16x128xf32>
    %8 = arith.maximumf %6, %7 : vector<16x128xf32>
    %9 = arith.truncf %8 : vector<16x128xf32> to vector<16x128xbf16>
    %c0_6 = arith.constant 0 : index
    %c0_7 = arith.constant 0 : index
    %10 = vector.load %arg4[%c0_6, %c0_7] : memref<128x256xbf16, #tpu.memory_space<vmem>>, vector<128x256xbf16>
    %cst_8 = arith.constant dense<0.000000e+00> : vector<16x256xf32>
    %11 = tpu.matmul %9, %10, %cst_8 {dimension_numbers = #tpu.dot_dimension_numbers<[1], [0], [0], [1], [0, 0, 1, 1], [], []>} : vector<16x128xbf16>, vector<128x256xbf16>, vector<16x256xf32> -> vector<16x256xf32>
    %c0_9 = arith.constant 0 : index
    %c0_10 = arith.constant 0 : index
    %12 = vector.load %arg5[%c0_9, %c0_10] : memref<1x256xf32, #tpu.memory_space<vmem>>, vector<1x256xf32>
    %13 = vector.broadcast %12 : vector<1x256xf32> to vector<16x256xf32>
    %14 = arith.addf %11, %13 : vector<16x256xf32>
    %cst_11 = arith.constant 0.000000e+00 : f32
    %15 = vector.broadcast %cst_11 : f32 to vector<16x256xf32>
    %16 = arith.maximumf %14, %15 : vector<16x256xf32>
    %c0_12 = arith.constant 0 : index
    %c0_13 = arith.constant 0 : index
    %17 = vector.load %arg6[%c0_12, %c0_13] : memref<1x256xf32, #tpu.memory_space<vmem>>, vector<1x256xf32>
    %18 = vector.broadcast %17 : vector<1x256xf32> to vector<16x256xf32>
    %19 = arith.mulf %16, %18 : vector<16x256xf32>
    %cst_14 = arith.constant dense<0.000000e+00> : vector<16xf32>
    %20 = vector.multi_reduction <add>, %19, %cst_14 [1] : vector<16x256xf32> to vector<16xf32>
    %21 = vector.shape_cast %20 : vector<16xf32> to vector<16x1xf32>
    %c0_15 = arith.constant 0 : index
    %c0_16 = arith.constant 0 : index
    %22 = memref.load %arg7[%c0_15, %c0_16] : memref<1x1xf32, #tpu.memory_space<smem>>
    %23 = vector.broadcast %22 : f32 to vector<16x1xf32>
    %24 = arith.addf %21, %23 : vector<16x1xf32>
    %25 = math.tanh %24 : vector<16x1xf32>
    %c0_17 = arith.constant 0 : index
    %c0_18 = arith.constant 0 : index
    %26 = vector.load %arg8[%c0_17, %c0_18] : memref<16x1xf32, #tpu.memory_space<vmem>>, vector<16x1xf32>
    tpu.vector_store %arg8[%c0_17, %c0_18], %25 {strides = array<i32>} : memref<16x1xf32, #tpu.memory_space<vmem>>, vector<16x1xf32>,
    return
  }
  func.func @transform_0(%arg0: i32) -> (i32, i32) {
    %c0_i32 = arith.constant 0 : i32
    %c0_i32_0 = arith.constant 0 : i32
    return %arg0, %c0_i32 : i32, i32
  }
  func.func @transform_1(%arg0: i32) -> (i32, i32) {
    %c0_i32 = arith.constant 0 : i32
    %c0_i32_0 = arith.constant 0 : i32
    %c0_i32_1 = arith.constant 0 : i32
    return %c0_i32, %c0_i32_0 : i32, i32
  }
  func.func @transform_2(%arg0: i32) -> (i32, i32) {
    %c0_i32 = arith.constant 0 : i32
    %c0_i32_0 = arith.constant 0 : i32
    %c0_i32_1 = arith.constant 0 : i32
    return %c0_i32, %c0_i32_0 : i32, i32
  }
  func.func @transform_3(%arg0: i32) -> (i32, i32) {
    %c0_i32 = arith.constant 0 : i32
    %c0_i32_0 = arith.constant 0 : i32
    %c0_i32_1 = arith.constant 0 : i32
    return %c0_i32, %c0_i32_0 : i32, i32
  }
  func.func @transform_4(%arg0: i32) -> (i32, i32) {
    %c0_i32 = arith.constant 0 : i32
    %c0_i32_0 = arith.constant 0 : i32
    %c0_i32_1 = arith.constant 0 : i32
    return %c0_i32, %c0_i32_0 : i32, i32
  }
  func.func @transform_5(%arg0: i32) -> (i32, i32) {
    %c0_i32 = arith.constant 0 : i32
    %c0_i32_0 = arith.constant 0 : i32
    %c0_i32_1 = arith.constant 0 : i32
    return %c0_i32, %c0_i32_0 : i32, i32
  }
  func.func @transform_6(%arg0: i32) -> (i32, i32) {
    %c0_i32 = arith.constant 0 : i32
    %c0_i32_0 = arith.constant 0 : i32
    %c0_i32_1 = arith.constant 0 : i32
    return %c0_i32, %c0_i32_0 : i32, i32
  }
  func.func @transform_7(%arg0: i32) -> (i32, i32) {
    %c0_i32 = arith.constant 0 : i32
    %c0_i32_0 = arith.constant 0 : i32
    return %arg0, %c0_i32 : i32, i32
  }
}

</mosaic_0001>

<bundles_post_ra>
// kernel: tpu_custom_call.1
= control target key start
LH: loop header
LB: loop body
LE: loop exit
PB: predicated region body
PF: predicated region fallthrough
CT: control target
= control target key end

     0   :  { %13 = vsyncpa [#allocation4], 0  ;;  %s580_s0 = inlined_call_operand.hbm [shape: f32[16,32], index: 0, kind: input, shape index: {}]   ;;  %s581_s1 = inlined_call_operand.hbm [shape: bf16[32,128], index: 1, kind: input, shape index: {}]   ;;  %s582_s2 = inlined_call_operand.vmem [shape: f32[1,128], index: 2, kind: input, shape index: {}]   ;;  %s583_s3 = inlined_call_operand.hbm [shape: bf16[128,256], index: 3, kind: input, shape index: {}]   ;;  %s584_s4 = inlined_call_operand.vmem [shape: f32[1,256], index: 4, kind: input, shape index: {}]   ;;  %s585_s5 = inlined_call_operand.vmem [shape: f32[1,256], index: 5, kind: input, shape index: {}]   ;;  %s586_s6 = inlined_call_operand.<no memory space> [shape: f32[1,1], index: 6, kind: input, shape index: {}]   ;;  %s587_s7 = inlined_call_operand.vmem [shape: f32[16,1], index: 7, kind: output, shape index: {}]  }
   0x1   :  { %14 = vsyncpa [#allocation6], 0  ;;  %s476_s24 = smov [#allocation5]   ;;  %s406_s28 = scalar_lea.hbm %s581_s1, 256 }
   0x2   :  { %s32_s25 = sshll.u32 %s476_s24, 4  ;;  %p407_p0 = scmp.ne.s32.totalorder %s581_s1, %s406_s28  ;;  %s33_s25 = int_to_ptr.vmem [resolvable:$true] %s32_s25 }
   0x3   :  { %p410_p1 = scmp.lt.u32.totalorder %s406_s28, %s581_s1 }
   0x5   :  { %p412_p2 = pnand %p410_p1, %p407_p0 }
   0x7   :  { %415 = shalt.err (!%p412_p2)
}
   0x8   :  { %s416_s10 = scalar_lea.vmem %s33_s25, 256  ;;  %p421_p4 = scmp.lt.s32.totalorder %s33_s25, %s33_s25 }
   0x9   :  { %p417_p3 = scmp.ne.s32.totalorder %s33_s25, %s416_s10  ;;  %p422_p5 = scmp.lt.s32.totalorder %s416_s10, %s416_s10 }
   0xb   :  { %p423_p6 = por %p422_p5, %p421_p4 }
   0xd   :  { %p424_p7 = pnand %p423_p6, %p417_p3 }
   0xf   :  { %427 = shalt.err (!%p424_p7)
}
  0x10   :  { %s477_s11 = smov 64   ;;  %s478_s12 = smov 4  }
  0x11   :  { %38 = dma.hbm_to_vmem [thread:$0]  %s581_s1, 256, %s33_s25, [#allocation6], %s477_s11, %s477_s11, %s478_s12  }
  0x12   :  { %s479_s15 = smov [#allocation3]   ;;  %s428_s19 = scalar_lea.hbm %s580_s0, 256 }
  0x13   :  { %s20_s16 = sshll.u32 %s479_s15, 4  ;;  %p429_p8 = scmp.ne.s32.totalorder %s580_s0, %s428_s19  ;;  %s21_s16 = int_to_ptr.vmem [resolvable:$true] %s20_s16 }
  0x14   :  { %p432_p9 = scmp.lt.u32.totalorder %s428_s19, %s580_s0 }
  0x16   :  { %p434_p10 = pnand %p432_p9, %p429_p8 }
  0x18   :  { %437 = shalt.err (!%p434_p10)
}
  0x19   :  { %s438_s24 = scalar_lea.vmem %s21_s16, 256  ;;  %p443_p12 = scmp.lt.s32.totalorder %s21_s16, %s21_s16 }
  0x1a   :  { %p439_p11 = scmp.ne.s32.totalorder %s21_s16, %s438_s24  ;;  %p444_p13 = scmp.lt.s32.totalorder %s438_s24, %s438_s24 }
  0x1c   :  { %p445_p0 = por %p444_p13, %p443_p12 }
  0x1e   :  { %p446_p1 = pnand %p445_p0, %p439_p11 }
  0x20   :  { %449 = shalt.err (!%p446_p1)
}
  0x21   :  { %s480_s1 = smov 128   ;;  %s481_s25 = smov 8  }
  0x22   :  { %26 = dma.hbm_to_vmem [thread:$0]  %s580_s0, 256, %s21_s16, [#allocation4], %s480_s1, %s480_s1, %s481_s25  }
  0x23   :  { %s482_s28 = smov [#allocation7]   ;;  %s450_s9 = scalar_lea.hbm %s583_s3, 2048 }
  0x24   :  { %s46_s29 = sshll.u32 %s482_s28, 4  ;;  %p451_p2 = scmp.ne.s32.totalorder %s583_s3, %s450_s9  ;;  %s47_s29 = int_to_ptr.vmem [resolvable:$true] %s46_s29 }
  0x25   :  { %p454_p3 = scmp.lt.u32.totalorder %s450_s9, %s583_s3 }
  0x27   :  { %p456_p4 = pnand %p454_p3, %p451_p2 }
  0x29   :  { %459 = shalt.err (!%p456_p4)
}
  0x2a   :  { %s460_s14 = scalar_lea.vmem %s47_s29, 2048  ;;  %p465_p6 = scmp.lt.s32.totalorder %s47_s29, %s47_s29 }
  0x2b   :  { %p461_p5 = scmp.ne.s32.totalorder %s47_s29, %s460_s14  ;;  %p466_p7 = scmp.lt.s32.totalorder %s460_s14, %s460_s14 }
  0x2d   :  { %p467_p8 = por %p466_p7, %p465_p6 }
  0x2f   :  { %p468_p9 = pnand %p467_p8, %p461_p5 }
  0x31   :  { %471 = shalt.err (!%p468_p9)
}
  0x32   :  { %52 = dma.hbm_to_vmem [thread:$0]  %s583_s3, 2048, %s47_s29, [#allocation6], %s480_s1, %s480_s1, %s481_s25  }
  0x33   :  { %472 = dma.done.wait [#allocation4], 256  }
  0x34   :  { %473 = vsyncadd [#allocation4], 4294967040 }
  0x35   :  { %474 = dma.done.wait [#allocation6], 2304  }
  0x36   :  { %475 = vsyncadd [#allocation6], 4294964992  ;;  %v483_v0 = vmov 0.0   ;;  %vm484_vm0 = vmmov 0   ;;  %v376_v1 = vld [vmem:[#allocation5] sm:$0xff]   ;;  %v377_v2 = vld [vmem:[#allocation5 + $0x8] sm:$0xff]   ;;  %v161_v33 = vlaneseq  ;;  %v321_v61 = vstv %s586_s6 }
  0x37   :  { %358 = vmatprep.subr.bf16.mxu0 %v483_v0  ;;  %362 = vmatprep.mubr.msk.bf16.mxu0 %vm484_vm0, %v483_v0  ;;  %v69_v3 = vld [vmem:[#allocation3] sm:$0xff]  ;;  %v70_v4 = vld [vmem:[#allocation3 + $0x8] sm:$0xff]  ;;  %v381_v7 = vld [vmem:[#allocation7 + $0x14] ss:$8 sps:$4 sm:$0xff]   ;;  %vm95_vm1 = vcmask 261120   ;;  %v485_v22 = vmov 0  }
  0x38   :  { %359 = vmatpush3.bf16.msra.mxu0 %v376_v1  ;;  %v378_v5 = vld [vmem:[#allocation7 + $0x4] ss:$8 sps:$4 sm:$0xff]   ;;  %v380_v6 = vld [vmem:[#allocation7] ss:$8 sps:$4 sm:$0xff]   ;;  %v71_v8 = vpack.c.bf16 %v70_v4, %v69_v3  ;;  %v383_v9 = vld [vmem:[#allocation7 + $0x10] ss:$8 sps:$4 sm:$0xff]   ;;  %283 = vmatprep.mubr.bf16.mxu1 %v485_v22 }
  0x39   :  { %360 = vmatprep.subr.bf16.mxu0 %v483_v0  ;;  %251 = vmatprep.subr.bf16.mxu1 %v378_v5  ;;  %v384_v10 = vld [vmem:[#allocation7 + $0x24] ss:$8 sps:$4 sm:$0xff]   ;;  %v386_v11 = vld [vmem:[#allocation7 + $0x20] ss:$8 sps:$4 sm:$0xff]   ;;  %v387_v12 = vld [vmem:[#allocation7 + $0x34] ss:$8 sps:$4 sm:$0xff]  }
  0x3a   :  { %252 = vmatpush1.bf16.msra.mxu1 %v380_v6  ;;  %v389_v13 = vld [vmem:[#allocation7 + $0x30] ss:$8 sps:$4 sm:$0xff]   ;;  %v390_v14 = vld [vmem:[#allocation7 + $0x44] ss:$8 sps:$4 sm:$0xff]   ;;  %v392_v15 = vld [vmem:[#allocation7 + $0x40] ss:$8 sps:$4 sm:$0xff]  }
  0x3b   :  { %253 = vmatprep.subr.bf16.mxu1 %v381_v7  ;;  %v393_v16 = vld [vmem:[#allocation7 + $0x54] ss:$8 sps:$4 sm:$0xff]   ;;  %v395_v17 = vld [vmem:[#allocation7 + $0x50] ss:$8 sps:$4 sm:$0xff]   ;;  %v396_v18 = vld [vmem:[#allocation7 + $0x64] ss:$8 sps:$4 sm:$0xff]  }
  0x3c   :  { %361 = vmatpush3.bf16.msra.mxu0 %v377_v2  ;;  %v398_v19 = vld [vmem:[#allocation7 + $0x60] ss:$8 sps:$4 sm:$0xff]   ;;  %v399_v20 = vld [vmem:[#allocation7 + $0x74] ss:$8 sps:$4 sm:$0xff]   ;;  %v401_v21 = vld [vmem:[#allocation7 + $0x70] ss:$8 sps:$4 sm:$0xff]  }
  0x3d   :  { %v335_v23 = vld [vmem:[%s582_s2] ss:$0 sm:$0xff]  ;;  %v162_v34 = vshrl.u32 %v161_v33, 7  ;;  %vm326_vm2 = vcmask 7168  }
  0x3e   :  { %254 = vmatpush1.bf16.msra.mxu1 %v383_v9  ;;  %v159_v36 = vld [vmem:[%s584_s4] sm:$0x3] }
  0x3f   :  { %363 = vmatmul.mubr.msk.bf16.vlgmr.msra.gmra.mrb[0].mxu0 %vm95_vm1, %v71_v8  ;;  %255 = vmatprep.subr.bf16.mxu1 %v384_v10  ;;  %v163_v35 = vsub.s32 0, %v162_v34  ;;  %v167_v37 = vsub.s32 1, %v162_v34  ;;  %v298_v40 = vld [vmem:[%s585_s5] sm:$0x3] }
  0x41   :  { %v164_v38 = vrot.slane %v159_v36, %v163_v35  ;;  %v168_v39 = vrot.slane %v159_v36, %v167_v37  ;;  %v303_v44 = vrot.slane %v298_v40, %v163_v35  ;;  %v307_v47 = vrot.slane %v298_v40, %v167_v37 }
  0x42   :  { %256 = vmatpush1.bf16.msra.mxu1 %v386_v11 }
  0x43   :  { %257 = vmatprep.subr.bf16.mxu1 %v387_v12 }
  0x46   :  { %258 = vmatpush1.bf16.msra.mxu1 %v389_v13 }
  0x47   :  { %259 = vmatprep.subr.bf16.mxu1 %v390_v14 }
  0x4a   :  { %260 = vmatpush1.bf16.msra.mxu1 %v392_v15 }
  0x4b   :  { %261 = vmatprep.subr.bf16.mxu1 %v393_v16 }
  0x4e   :  { %262 = vmatpush1.bf16.msra.mxu1 %v395_v17 }
  0x4f   :  { %263 = vmatprep.subr.bf16.mxu1 %v396_v18 }
  0x52   :  { %264 = vmatpush1.bf16.msra.mxu1 %v398_v19 }
  0x53   :  { %265 = vmatprep.subr.bf16.mxu1 %v399_v20 }
  0x56   :  { %266 = vmatpush1.bf16.msra.mxu1 %v401_v21 }
 0x112   :  { %v133_v24 = vpop.f32.mrb[0].mxu0 }
 0x113   :  { %v134_v25 = vadd.f32 %v335_v23, %v133_v24  ;;  %v364_v26 = vpop.f32.mrb[1].mxu0 }
 0x114   :  { %v136_v27 = vpop.f32.mrb[2].mxu0 }
 0x115   :  { %v137_v28 = vadd.f32 %v335_v23, %v136_v27  ;;  %v365_v29 = vpop.f32.mrb[3].mxu0  ;;  %v140_v30 = vmax.f32 %v134_v25, 0.0 }
 0x117   :  { %v141_v31 = vmax.f32 %v137_v28, 0.0 }
 0x119   :  { %v142_v32 = vpack.c.bf16 %v141_v31, %v140_v30 }
 0x11b   :  { %284 = vmatmul.mubr.bf16.vlgmr.msra.gmra.mrb[0].mxu1 %v142_v32 }
 0x1ee   :  { %v285_v41 = vpop.f32.mrb[0].mxu1 }
 0x1ef   :  { %v286_v42 = vadd.f32 %v285_v41, %v164_v38  ;;  %v287_v43 = vpop.f32.mrb[1].mxu1 }
 0x1f0   :  { %v288_v45 = vadd.f32 %v287_v43, %v168_v39  ;;  %v289_v46 = vpop.f32.mrb[2].mxu1 }
 0x1f1   :  { %v294_v48 = vmax.f32 %v286_v42, 0.0  ;;  %v290_v49 = vadd.f32 %v289_v46, %v164_v38  ;;  %v291_v50 = vpop.f32.mrb[3].mxu1 }
 0x1f2   :  { %v295_v51 = vmax.f32 %v288_v45, 0.0  ;;  %v292_v52 = vadd.f32 %v291_v50, %v168_v39 }
 0x1f3   :  { %v296_v53 = vmax.f32 %v290_v49, 0.0  ;;  %v310_v54 = vmul.f32 %v303_v44, %v294_v48 }
 0x1f4   :  { %v297_v55 = vmax.f32 %v292_v52, 0.0  ;;  %v311_v56 = vmul.f32 %v307_v47, %v295_v51 }
 0x1f5   :  { %v312_v57 = vmul.f32 %v303_v44, %v296_v53 }
 0x1f6   :  { %v313_v58 = vmul.f32 %v307_v47, %v297_v55  ;;  %v314_v59 = vadd.f32 %v311_v56, %v310_v54 }
 0x1f8   :  { %315 = vadd.xlane.f32.xlu0 %v314_v59  ;;  %v317_v60 = vadd.f32 %v313_v58, %v312_v57 }
 0x1fc   :  { %318 = vadd.xlane.f32.xlu0 %v317_v60 }
 0x285   :  { %v316_v62 = vpop.xlane.xlu0 %315 }
 0x286   :  { %v322_v63 = vadd.f32 %v321_v61, %v316_v62 }
 0x288   :  { %402 = vtanh.f32 %v322_v63 }
 0x289   :  { %v319_v0 = vpop.xlane.xlu0 %318 }
 0x28a   :  { %v323_v1 = vadd.f32 %v321_v61, %v319_v0 }
 0x28c   :  { %404 = vtanh.f32 %v323_v1 }
 0x292   :  { %v403_v2 = vpop.eup %402 }
 0x293   :  { %327 = vst.msk [vmem:[%s587_s7] sm:$0xff] %vm326_vm2, %v403_v2 }
 0x296   :  { %v405_v3 = vpop.eup %404 }
 0x297   :  { %328 = vst.msk [vmem:[%s587_s7 + $0x8] sm:$0xff] %vm326_vm2, %v405_v3 }
 0x298   :  { %333 = vsyncpa [#allocation4], 1 }
 0x299   :  { %334 = vsyncpa [#allocation6], 1 }

</bundles_post_ra>
